<compile_context>
chip_gen: v7x
topology: tpu7x:2x2x1
jax: 0.10.0
libtpu: 0.0.40
codegen_flags: <defaults>
</compile_context>

<pallas_src>
import functools

import jax
import jax.numpy as jnp
from jax.experimental import pallas as pl
from jax.experimental.pallas import tpu as pltpu

LANE = 128


# ----------------------------- helpers --------------------------------------

def _round_up(n, m=LANE):
    return ((n + m - 1) // m) * m


def _pad_axis(a, size, axis):
    pad = size - a.shape[axis]
    if pad == 0:
        return a
    widths = [(0, 0)] * a.ndim
    widths[axis] = (0, pad)
    return jnp.pad(a, widths)


def _tile_candidates(d):
    """Descending lane-multiple tile sizes that divide d (full dim first)."""
    cs = [d]
    for c in (2048, 1024, 512, 256, 128):
        if c < d and d % c == 0:
            cs.append(c)
    return cs


def _pick_tiles(m, k_dim, n_dim, x_bytes, out_bytes,
                budget_bytes=16 * 1024 * 1024):
    """Pick (tn, tk) minimizing grid steps subject to a VMEM budget."""
    best_key, best = None, (min(128, n_dim), min(128, k_dim))
    for tn in _tile_candidates(n_dim):
        for tk in _tile_candidates(k_dim):
            vmem = (2 * m * tk * x_bytes      # activation tile, double-buffered
                    + 2 * tk * tn * 2         # bf16 weight tile, double-buffered
                    + 2 * m * tn * out_bytes  # output tile, double-buffered
                    + m * tn * 4              # f32 accumulator scratch
                    + 6 * tn * 4)             # bias / gamma / beta rows
            if vmem > budget_bytes:
                continue
            steps = (n_dim // tn) * (k_dim // tk)
            key = (steps, -tk, -tn)
            if best_key is None or key < best_key:
                best_key, best = key, (tn, tk)
    return best


# ----------------------------- Pallas kernel --------------------------------

def _fused_linear_kernel(*refs, has_bn, apply_relu, eps):
    """y = x @ W + b, optionally followed by BatchNorm1d (training-mode batch
    statistics over the full, un-tiled batch axis) and ReLU."""
    if has_bn:
        x_ref, w_ref, b_ref, g_ref, bt_ref, o_ref, acc_ref = refs
    else:
        x_ref, w_ref, b_ref, o_ref, acc_ref = refs
        g_ref = bt_ref = None

    k = pl.program_id(1)

    @pl.when(k == 0)
    def _init():
        acc_ref[...] = jnp.zeros_like(acc_ref)

    # bf16 operands -> MXU, f32 accumulate.
    acc_ref[...] += jnp.dot(
        x_ref[...].astype(jnp.bfloat16),
        w_ref[...].astype(jnp.bfloat16),
        preferred_element_type=jnp.float32,
    )

    @pl.when(k == pl.num_programs(1) - 1)
    def _epilogue():
        y = acc_ref[...] + b_ref[...]          # bias added exactly once
        if has_bn:
            mean = jnp.mean(y, axis=0, keepdims=True)
            var = jnp.mean((y - mean) * (y - mean), axis=0, keepdims=True)
            y = (y - mean) * jax.lax.rsqrt(var + eps) * g_ref[...] + bt_ref[...]
        if apply_relu:
            y = jnp.maximum(y, 0.0)
        o_ref[...] = y.astype(o_ref.dtype)


# ----------------------------- wrapper ---------------------------------------

def fused_linear_pallas(x, w, b, gamma=None, beta=None, *, apply_relu=False,
                        eps=1e-5, out_dtype=jnp.float32):
    """x: (M, K), w: (K, N) bf16, b/gamma/beta: (1, N) f32.  K, N % 128 == 0.

    The full batch M is kept as one block (required for exact BN batch stats);
    the grid tiles N (parallel) and the K reduction (arbitrary, last).
    """
    m, k_dim = x.shape
    n_dim = w.shape[1]
    has_bn = gamma is not None

    x_bytes = jnp.dtype(x.dtype).itemsize
    out_bytes = jnp.dtype(out_dtype).itemsize
    tn, tk = _pick_tiles(m, k_dim, n_dim, x_bytes, out_bytes)
    grid = (n_dim // tn, k_dim // tk)

    in_specs = [
        pl.BlockSpec((m, tk), lambda j, k: (0, k)),    # activations
        pl.BlockSpec((tk, tn), lambda j, k: (k, j)),   # weights (bf16)
        pl.BlockSpec((1, tn), lambda j, k: (0, j)),    # bias row
    ]
    inputs = [x, w, b]
    if has_bn:
        in_specs += [pl.BlockSpec((1, tn), lambda j, k: (0, j)),
                     pl.BlockSpec((1, tn), lambda j, k: (0, j))]
        inputs += [gamma, beta]

    kernel = functools.partial(_fused_linear_kernel, has_bn=has_bn,
                               apply_relu=apply_relu, eps=eps)

    cost = pl.CostEstimate(
        flops=2 * m * k_dim * n_dim,
        transcendentals=0,
        bytes_accessed=int(m * k_dim * x_bytes + k_dim * n_dim * 2
                           + m * n_dim * out_bytes),
    )

    return pl.pallas_call(
        kernel,
        out_shape=jax.ShapeDtypeStruct((m, n_dim), out_dtype),
        grid_spec=pltpu.PrefetchScalarGridSpec(
            num_scalar_prefetch=0,
            grid=grid,
            in_specs=in_specs,
            out_specs=pl.BlockSpec((m, tn), lambda j, k: (0, j)),
            scratch_shapes=[pltpu.VMEM((m, tn), jnp.float32)],
        ),
        compiler_params=pltpu.CompilerParams(
            dimension_semantics=("parallel", "arbitrary"),
            vmem_limit_bytes=32 * 1024 * 1024,
        ),
        cost_estimate=cost,
    )(*inputs)


# ----------------------------- MLP module ------------------------------------

def init_mlp_params(key, in_dim, hidden_dims, bias=True, batchnorm_last=False):
    """Mirrors PyTorch defaults: Linear U(-1/sqrt(fan_in), 1/sqrt(fan_in)),
    BatchNorm1d gamma=1, beta=0.  Weights stored pre-transposed (in, out), bf16."""
    if isinstance(hidden_dims, int):
        hidden_dims = (hidden_dims,)
    dims = (in_dim,) + tuple(hidden_dims)
    params = {"linears": [], "bns": [], "batchnorm_last": batchnorm_last}
    for i in range(len(hidden_dims)):
        fan_in, fan_out = dims[i], dims[i + 1]
        key, kw, kb = jax.random.split(key, 3)
        bound = 1.0 / jnp.sqrt(jnp.float32(fan_in))
        w = jax.random.uniform(kw, (fan_in, fan_out), jnp.float32, -bound, bound)
        w = w.astype(jnp.bfloat16)                      # bf16 weight streaming
        if bias:
            b = jax.random.uniform(kb, (1, fan_out), jnp.float32, -bound, bound)
        else:
            b = jnp.zeros((1, fan_out), jnp.float32)
        params["linears"].append((w, b))
        if i < len(hidden_dims) - 1:                    # BN between linears
            params["bns"].append((jnp.ones((1, fan_out), jnp.float32),
                                  jnp.zeros((1, fan_out), jnp.float32)))
    if batchnorm_last:
        params["bn_last"] = (jnp.ones((1, dims[-1]), jnp.float32),
                             jnp.zeros((1, dims[-1]), jnp.float32))
    return params


def mlp_forward_pallas(params, x):
    """Linear -> (BN -> ReLU -> Linear)* -> optional BN, with BN/ReLU fused into
    the preceding Linear's epilogue.  Training-mode BN (batch statistics)."""
    # TODO(synk): eval-mode BatchNorm (running statistics) is not implemented;
    # this matches PyTorch's .train() forward semantics.
    linears = params["linears"]
    bns = params["bns"]
    n_layers = len(linears)
    out_dim = linears[-1][0].shape[1]

    # Zero-pad feature dims to lane multiples (padded columns stay exactly 0
    # through matmul/bias/BN/ReLU, so they never contaminate real outputs).
    # Intermediate activations travel as bf16 (next matmul casts to bf16 anyway).
    y = _pad_axis(x.astype(jnp.bfloat16), _round_up(x.shape[1]), axis=1)

    for i, (w, b) in enumerate(linears):
        din, dout = w.shape
        din_p, dout_p = _round_up(din), _round_up(dout)
        w_p = _pad_axis(_pad_axis(w, din_p, 0), dout_p, 1)
        b_p = _pad_axis(b, dout_p, 1)

        is_last = i == n_layers - 1
        out_dtype = jnp.float32 if is_last else jnp.bfloat16
        if not is_last:
            g, bt = bns[i]
            y = fused_linear_pallas(y, w_p, b_p,
                                    gamma=_pad_axis(g, dout_p, 1),
                                    beta=_pad_axis(bt, dout_p, 1),
                                    apply_relu=True, out_dtype=out_dtype)
        elif params["batchnorm_last"]:
            g, bt = params["bn_last"]
            y = fused_linear_pallas(y, w_p, b_p,
                                    gamma=_pad_axis(g, dout_p, 1),
                                    beta=_pad_axis(bt, dout_p, 1),
                                    apply_relu=False, out_dtype=out_dtype)
        else:
            y = fused_linear_pallas(y, w_p, b_p, out_dtype=out_dtype)
    return y[:, :out_dim]


def mlp_forward_ref(params, x):
    """Pure-JAX reference mirroring the kernel's MXU precision (bf16 in, f32 acc)."""
    def dot_mxu(a, w):
        return jnp.dot(a.astype(jnp.bfloat16), w.astype(jnp.bfloat16),
                       preferred_element_type=jnp.float32)

    def bn(v, g, b, eps=1e-5):
        m = jnp.mean(v, axis=0, keepdims=True)
        var = jnp.mean((v - m) ** 2, axis=0, keepdims=True)
        return (v - m) * jax.lax.rsqrt(var + eps) * g + b

    linears = params["linears"]
    bns = params["bns"]
    n = len(linears)
    y = x.astype(jnp.float32)
    for i, (w, b) in enumerate(linears):
        y = dot_mxu(y, w) + b
        if i < n - 1:
            g, bt = bns[i]
            y = jnp.maximum(bn(y, g, bt), 0.0)
    if params["batchnorm_last"]:
        g, bt = params["bn_last"]
        y = bn(y, g, bt)
    return y


if __name__ == "__main__":
    key = jax.random.PRNGKey(0)
    k_p1, k_p2, k_x1, k_x2 = jax.random.split(key, 4)

    # Config 1: small demo shapes (single tile per layer after padding).
    batch, in_dim = 8, 16
    hidden_dims = (32, 16)
    params = init_mlp_params(k_p1, in_dim, hidden_dims, bias=True,
                             batchnorm_last=False)
    x = jax.random.normal(k_x1, (batch, in_dim), jnp.float32)
    out = jax.block_until_ready(mlp_forward_pallas(params, x))
    ref = mlp_forward_ref(params, x)
    assert out.shape == (batch, hidden_dims[-1])
    assert jnp.allclose(out, ref, atol=2e-3, rtol=2e-3), "config1 mismatch"

    # Config 2: exercises multi-lane feature dims, the batchnorm_last (BN
    # without ReLU) epilogue, and the tile picker on larger padded dims.
    in_dim2, hidden2 = 640, (384, 256)
    params2 = init_mlp_params(k_p2, in_dim2, hidden2, bias=True,
                              batchnorm_last=True)
    x2 = jax.random.normal(k_x2, (batch, in_dim2), jnp.float32)
    out2 = jax.block_until_ready(mlp_forward_pallas(params2, x2))
    ref2 = mlp_forward_ref(params2, x2)
    assert out2.shape == (batch, hidden2[-1])
    assert jnp.allclose(out2, ref2, atol=2e-3, rtol=2e-3), "config2 mismatch"

    print("KERNEL_OK")
</pallas_src>

<mosaic_0001>
module attributes {stable_mosaic.version = 11 : i64} {
  func.func @_fused_linear_kernel(%arg0: i32, %arg1: i32, %arg2: memref<8x128xbf16, #tpu.memory_space<vmem>>, %arg3: memref<128x128xbf16, #tpu.memory_space<vmem>>, %arg4: memref<1x128xf32, #tpu.memory_space<vmem>>, %arg5: memref<1x128xf32, #tpu.memory_space<vmem>>, %arg6: memref<1x128xf32, #tpu.memory_space<vmem>>, %arg7: memref<8x128xbf16, #tpu.memory_space<vmem>>, %arg8: memref<8x128xf32, #tpu.memory_space<vmem>>) attributes {dimension_semantics = [#tpu.dimension_semantics<parallel>, #tpu.dimension_semantics<arbitrary>], iteration_bounds = array<i64: 1, 1>, scalar_prefetch = 0 : i64, scratch_operands = 1 : i64, tpu.core_type = #tpu.core_type<tc>, window_params = [{transform_indices = @transform_0, window_bounds = array<i64: 8, 128>}, {transform_indices = @transform_1, window_bounds = array<i64: 128, 128>}, {transform_indices = @transform_2, window_bounds = array<i64: 1, 128>}, {transform_indices = @transform_3, window_bounds = array<i64: 1, 128>}, {transform_indices = @transform_4, window_bounds = array<i64: 1, 128>}, {transform_indices = @transform_5, window_bounds = array<i64: 8, 128>}]} {
    %c0_i32 = arith.constant 0 : i32
    %0 = arith.cmpi eq, %arg1, %c0_i32 : i32
    %1 = arith.extui %0 : i1 to i32
    %c0_i32_0 = arith.constant 0 : i32
    %2 = arith.cmpi ne, %1, %c0_i32_0 : i32
    scf.if %2 {
      %cst_10 = arith.constant 0.000000e+00 : f32
      %12 = vector.broadcast %cst_10 : f32 to vector<8x128xf32>
      %c0_11 = arith.constant 0 : index
      %c0_12 = arith.constant 0 : index
      %13 = vector.load %arg8[%c0_11, %c0_12] : memref<8x128xf32, #tpu.memory_space<vmem>>, vector<8x128xf32>
      tpu.vector_store %arg8[%c0_11, %c0_12], %12 {strides = array<i32>} : memref<8x128xf32, #tpu.memory_space<vmem>>, vector<8x128xf32>,
    } else {
    }
    %c0 = arith.constant 0 : index
    %c0_1 = arith.constant 0 : index
    %3 = vector.load %arg8[%c0, %c0_1] : memref<8x128xf32, #tpu.memory_space<vmem>>, vector<8x128xf32>
    %c0_2 = arith.constant 0 : index
    %c0_3 = arith.constant 0 : index
    %4 = vector.load %arg2[%c0_2, %c0_3] : memref<8x128xbf16, #tpu.memory_space<vmem>>, vector<8x128xbf16>
    %c0_4 = arith.constant 0 : index
    %c0_5 = arith.constant 0 : index
    %5 = vector.load %arg3[%c0_4, %c0_5] : memref<128x128xbf16, #tpu.memory_space<vmem>>, vector<128x128xbf16>
    %cst = arith.constant dense<0.000000e+00> : vector<8x128xf32>
    %6 = tpu.matmul %4, %5, %cst {dimension_numbers = #tpu.dot_dimension_numbers<[1], [0], [0], [1], [0, 0, 1, 1], [], []>} : vector<8x128xbf16>, vector<128x128xbf16>, vector<8x128xf32> -> vector<8x128xf32>
    %7 = arith.addf %3, %6 : vector<8x128xf32>
    %c0_6 = arith.constant 0 : index
    %c0_7 = arith.constant 0 : index
    %8 = vector.load %arg8[%c0_6, %c0_7] : memref<8x128xf32, #tpu.memory_space<vmem>>, vector<8x128xf32>
    tpu.vector_store %arg8[%c0_6, %c0_7], %7 {strides = array<i32>} : memref<8x128xf32, #tpu.memory_space<vmem>>, vector<8x128xf32>,
    %c0_i32_8 = arith.constant 0 : i32
    %9 = arith.cmpi eq, %arg1, %c0_i32_8 : i32
    %10 = arith.extui %9 : i1 to i32
    %c0_i32_9 = arith.constant 0 : i32
    %11 = arith.cmpi ne, %10, %c0_i32_9 : i32
    scf.if %11 {
      %c0_10 = arith.constant 0 : index
      %c0_11 = arith.constant 0 : index
      %12 = vector.load %arg8[%c0_10, %c0_11] : memref<8x128xf32, #tpu.memory_space<vmem>>, vector<8x128xf32>
      %c0_12 = arith.constant 0 : index
      %c0_13 = arith.constant 0 : index
      %13 = vector.load %arg4[%c0_12, %c0_13] : memref<1x128xf32, #tpu.memory_space<vmem>>, vector<1x128xf32>
      %14 = vector.broadcast %13 : vector<1x128xf32> to vector<8x128xf32>
      %15 = arith.addf %12, %14 : vector<8x128xf32>
      %cst_14 = arith.constant dense<0.000000e+00> : vector<128xf32>
      %16 = vector.multi_reduction <add>, %15, %cst_14 [0] : vector<8x128xf32> to vector<128xf32>
      %17 = vector.shape_cast %16 : vector<128xf32> to vector<1x128xf32>
      %cst_15 = arith.constant 8.000000e+00 : f32
      %18 = vector.broadcast %cst_15 : f32 to vector<1x128xf32>
      %19 = arith.divf %17, %18 : vector<1x128xf32>
      %20 = vector.broadcast %19 : vector<1x128xf32> to vector<8x128xf32>
      %21 = arith.subf %15, %20 : vector<8x128xf32>
      %22 = vector.broadcast %19 : vector<1x128xf32> to vector<8x128xf32>
      %23 = arith.subf %15, %22 : vector<8x128xf32>
      %24 = arith.mulf %21, %23 : vector<8x128xf32>
      %cst_16 = arith.constant dense<0.000000e+00> : vector<128xf32>
      %25 = vector.multi_reduction <add>, %24, %cst_16 [0] : vector<8x128xf32> to vector<128xf32>
      %26 = vector.shape_cast %25 : vector<128xf32> to vector<1x128xf32>
      %cst_17 = arith.constant 8.000000e+00 : f32
      %27 = vector.broadcast %cst_17 : f32 to vector<1x128xf32>
      %28 = arith.divf %26, %27 : vector<1x128xf32>
      %29 = vector.broadcast %19 : vector<1x128xf32> to vector<8x128xf32>
      %30 = arith.subf %15, %29 : vector<8x128xf32>
      %cst_18 = arith.constant 9.99999974E-6 : f32
      %31 = vector.broadcast %cst_18 : f32 to vector<1x128xf32>
      %32 = arith.addf %28, %31 : vector<1x128xf32>
      %33 = math.rsqrt %32 : vector<1x128xf32>
      %34 = vector.broadcast %33 : vector<1x128xf32> to vector<8x128xf32>
      %35 = arith.mulf %30, %34 : vector<8x128xf32>
      %c0_19 = arith.constant 0 : index
      %c0_20 = arith.constant 0 : index
      %36 = vector.load %arg5[%c0_19, %c0_20] : memref<1x128xf32, #tpu.memory_space<vmem>>, vector<1x128xf32>
      %37 = vector.broadcast %36 : vector<1x128xf32> to vector<8x128xf32>
      %38 = arith.mulf %35, %37 : vector<8x128xf32>
      %c0_21 = arith.constant 0 : index
      %c0_22 = arith.constant 0 : index
      %39 = vector.load %arg6[%c0_21, %c0_22] : memref<1x128xf32, #tpu.memory_space<vmem>>, vector<1x128xf32>
      %40 = vector.broadcast %39 : vector<1x128xf32> to vector<8x128xf32>
      %41 = arith.addf %38, %40 : vector<8x128xf32>
      %cst_23 = arith.constant 0.000000e+00 : f32
      %42 = vector.broadcast %cst_23 : f32 to vector<8x128xf32>
      %43 = arith.maximumf %41, %42 : vector<8x128xf32>
      %44 = arith.truncf %43 : vector<8x128xf32> to vector<8x128xbf16>
      %c0_24 = arith.constant 0 : index
      %c0_25 = arith.constant 0 : index
      %45 = vector.load %arg7[%c0_24, %c0_25] : memref<8x128xbf16, #tpu.memory_space<vmem>>, vector<8x128xbf16>
      tpu.vector_store %arg7[%c0_24, %c0_25], %44 {strides = array<i32>} : memref<8x128xbf16, #tpu.memory_space<vmem>>, vector<8x128xbf16>,
    } else {
    }
    return
  }
  func.func @transform_0(%arg0: i32, %arg1: i32) -> (i32, i32) {
    %c0_i32 = arith.constant 0 : i32
    %c0_i32_0 = arith.constant 0 : i32
    return %c0_i32, %arg1 : i32, i32
  }
  func.func @transform_1(%arg0: i32, %arg1: i32) -> (i32, i32) {
    %c0_i32 = arith.constant 0 : i32
    return %arg1, %arg0 : i32, i32
  }
  func.func @transform_2(%arg0: i32, %arg1: i32) -> (i32, i32) {
    %c0_i32 = arith.constant 0 : i32
    %c0_i32_0 = arith.constant 0 : i32
    return %c0_i32, %arg0 : i32, i32
  }
  func.func @transform_3(%arg0: i32, %arg1: i32) -> (i32, i32) {
    %c0_i32 = arith.constant 0 : i32
    %c0_i32_0 = arith.constant 0 : i32
    return %c0_i32, %arg0 : i32, i32
  }
  func.func @transform_4(%arg0: i32, %arg1: i32) -> (i32, i32) {
    %c0_i32 = arith.constant 0 : i32
    %c0_i32_0 = arith.constant 0 : i32
    return %c0_i32, %arg0 : i32, i32
  }
  func.func @transform_5(%arg0: i32, %arg1: i32) -> (i32, i32) {
    %c0_i32 = arith.constant 0 : i32
    %c0_i32_0 = arith.constant 0 : i32
    return %c0_i32, %arg0 : i32, i32
  }
}

</mosaic_0001>

<bundles_post_ra>
// kernel: tpu_custom_call.1
= control target key start
LH: loop header
LB: loop body
LE: loop exit
PB: predicated region body
PF: predicated region fallthrough
CT: control target
= control target key end

     0   :  { %10 = vsyncpa [#allocation4], 0  ;;  %s446_s0 = inlined_call_operand.hbm [shape: bf16[8,128], index: 0, kind: input, shape index: {}]   ;;  %s447_s1 = inlined_call_operand.hbm [shape: bf16[128,128], index: 1, kind: input, shape index: {}]   ;;  %s448_s2 = inlined_call_operand.vmem [shape: f32[1,128], index: 2, kind: input, shape index: {}]   ;;  %s449_s3 = inlined_call_operand.vmem [shape: f32[1,128], index: 3, kind: input, shape index: {}]   ;;  %s450_s4 = inlined_call_operand.vmem [shape: f32[1,128], index: 4, kind: input, shape index: {}]   ;;  %s451_s5 = inlined_call_operand.hbm [shape: bf16[8,128], index: 5, kind: output, shape index: {}]  }
   0x1   :  { %11 = vsyncpa [#allocation7], 0 }
   0x2   :  { %12 = vsyncpa [#allocation5], 0  ;;  %s357_s18 = smov [#allocation3]   ;;  %s358_s20 = smov [#allocation6]  }
   0x3   :  { %s19_s19 = sshll.u32 %s357_s18, 4  ;;  %s28_s21 = sshll.u32 %s358_s20, 4  ;;  %s20_s19 = int_to_ptr.vmem [resolvable:$true] %s19_s19  ;;  %s394_s21 = int_to_ptr.vmem [resolvable:$true] %s28_s21 }
   0x4   :  { %s285_s24 = scalar_lea.hbm %s446_s0, 64 }
   0x5   :  { %p286_p0 = scmp.ne.s32.totalorder %s446_s0, %s285_s24  ;;  %p289_p1 = scmp.lt.u32.totalorder %s285_s24, %s446_s0 }
   0x7   :  { %p291_p2 = pnand %p289_p1, %p286_p0 }
   0x9   :  { %294 = shalt.err (!%p291_p2)
}
   0xa   :  { %s295_s29 = scalar_lea.vmem %s20_s19, 64  ;;  %p300_p4 = scmp.lt.s32.totalorder %s20_s19, %s20_s19 }
   0xb   :  { %p296_p3 = scmp.ne.s32.totalorder %s20_s19, %s295_s29  ;;  %p301_p5 = scmp.lt.s32.totalorder %s295_s29, %s295_s29 }
   0xd   :  { %p302_p6 = por %p301_p5, %p300_p4 }
   0xf   :  { %p303_p7 = pnand %p302_p6, %p296_p3 }
  0x11   :  { %306 = shalt.err (!%p303_p7)
}
  0x12   :  { %22 = dma.hbm_to_vmem [thread:$0]  %s446_s0, 64, %s20_s19, [#allocation4]  }
  0x13   :  { %s307_s9 = scalar_lea.hbm %s447_s1, 1024 }
  0x14   :  { %p308_p8 = scmp.ne.s32.totalorder %s447_s1, %s307_s9  ;;  %p311_p9 = scmp.lt.u32.totalorder %s307_s9, %s447_s1 }
  0x16   :  { %p313_p10 = pnand %p311_p9, %p308_p8 }
  0x18   :  { %316 = shalt.err (!%p313_p10)
}
  0x19   :  { %s317_s14 = scalar_lea.vmem %s394_s21, 1024  ;;  %p322_p12 = scmp.lt.s32.totalorder %s394_s21, %s394_s21 }
  0x1a   :  { %p318_p11 = scmp.ne.s32.totalorder %s394_s21, %s317_s14  ;;  %p323_p13 = scmp.lt.s32.totalorder %s317_s14, %s317_s14 }
  0x1c   :  { %p324_p0 = por %p323_p13, %p322_p12 }
  0x1e   :  { %p325_p1 = pnand %p324_p0, %p318_p11 }
  0x20   :  { %328 = shalt.err (!%p325_p1)
}
  0x21   :  { %s359_s0 = smov 64   ;;  %s360_s15 = smov 4  }
  0x22   :  { %34 = dma.hbm_to_vmem [thread:$0]  %s447_s1, 1024, %s394_s21, [#allocation7], %s359_s0, %s359_s0, %s360_s15  }
  0x23   :  { %351 = dma.done.wait [#allocation4], 64  }
  0x24   :  { %352 = vsyncadd [#allocation4], 4294967232 }
  0x25   :  { %353 = dma.done.wait [#allocation7], 1024  }
  0x26   :  { %354 = vsyncadd [#allocation7], 4294966272  ;;  %v361_v0 = vmov 0.0   ;;  %vm362_vm0 = vmmov 0   ;;  %v275_v1 = vld [vmem:[#allocation6] sm:$0xff]   ;;  %v276_v2 = vld [vmem:[#allocation6 + $0x8] sm:$0xff]  }
  0x27   :  { %248 = vmatprep.subr.bf16.mxu0 %v361_v0  ;;  %264 = vmatprep.mubr.msk.bf16.mxu0 %vm362_vm0, %v361_v0  ;;  %v277_v3 = vld [vmem:[#allocation6 + $0x10] sm:$0xff]   ;;  %v278_v4 = vld [vmem:[#allocation6 + $0x18] sm:$0xff]   ;;  %v279_v5 = vld [vmem:[#allocation6 + $0x20] sm:$0xff]   ;;  %s363_s22 = smov [#allocation8]  }
  0x28   :  { %249 = vmatpush3.bf16.msra.mxu0 %v275_v1  ;;  %v280_v6 = vld [vmem:[#allocation6 + $0x28] sm:$0xff]   ;;  %v281_v7 = vld [vmem:[#allocation6 + $0x30] sm:$0xff]   ;;  %v282_v8 = vld [vmem:[#allocation6 + $0x38] sm:$0xff]   ;;  %s218_s23 = sshll.u32 %s363_s22, 4  ;;  %s219_s23 = int_to_ptr.vmem [resolvable:$true] %s218_s23 }
  0x29   :  { %250 = vmatprep.subr.bf16.mxu0 %v361_v0  ;;  %v54_v9 = vld [vmem:[#allocation3] sm:$0xf]  ;;  %s329_s24 = scalar_lea.vmem %s219_s23, 64  ;;  %p334_p3 = scmp.lt.s32.totalorder %s219_s23, %s219_s23 }
  0x2a   :  { %v236_v10 = vld [vmem:[%s448_s2] ss:$0 sm:$0xff]  ;;  %p330_p2 = scmp.ne.s32.totalorder %s219_s23, %s329_s24  ;;  %p335_p4 = scmp.lt.s32.totalorder %s329_s24, %s329_s24 }
  0x2b   :  { %v237_v34 = vld [vmem:[%s449_s3] ss:$0 sm:$0xff] }
  0x2c   :  { %251 = vmatpush3.bf16.msra.mxu0 %v276_v2  ;;  %v238_v36 = vld [vmem:[%s450_s4] ss:$0 sm:$0xff]  ;;  %p336_p5 = por %p335_p4, %p334_p3 }
  0x2d   :  { %252 = vmatprep.subr.bf16.mxu0 %v361_v0 }
  0x2e   :  { %p337_p6 = pnand %p336_p5, %p330_p2 }
  0x30   :  { %253 = vmatpush3.bf16.msra.mxu0 %v277_v3 }
  0x31   :  { %254 = vmatprep.subr.bf16.mxu0 %v361_v0 }
  0x34   :  { %255 = vmatpush3.bf16.msra.mxu0 %v278_v4 }
  0x35   :  { %256 = vmatprep.subr.bf16.mxu0 %v361_v0 }
  0x38   :  { %257 = vmatpush3.bf16.msra.mxu0 %v279_v5 }
  0x39   :  { %258 = vmatprep.subr.bf16.mxu0 %v361_v0 }
  0x3c   :  { %259 = vmatpush3.bf16.msra.mxu0 %v280_v6 }
  0x3d   :  { %260 = vmatprep.subr.bf16.mxu0 %v361_v0 }
  0x40   :  { %261 = vmatpush3.bf16.msra.mxu0 %v281_v7 }
  0x41   :  { %262 = vmatprep.subr.bf16.mxu0 %v361_v0 }
  0x44   :  { %263 = vmatpush3.bf16.msra.mxu0 %v282_v8 }
  0x47   :  { %265 = vmatmul.mubr.bf16.vlgmr.msra.gmra.mrb[0].mxu0 %v54_v9 }
 0x11a   :  { %v153_v11 = vpop.f32.mrb[0].mxu0 }
 0x11b   :  { %v172_v12 = vadd.f32 %v236_v10, %v153_v11  ;;  %v266_v13 = vpop.f32.mrb[1].mxu0 }
 0x11c   :  { %v156_v14 = vpop.f32.mrb[2].mxu0 }
 0x11d   :  { %v173_v15 = vrot.slane %v172_v12, 4  ;;  %v267_v16 = vpop.f32.mrb[3].mxu0 }
 0x11f   :  { %v174_v17 = vadd.f32 %v173_v15, %v172_v12 }
 0x121   :  { %v175_v18 = vrot.slane %v174_v17, 2 }
 0x123   :  { %v176_v19 = vadd.f32 %v175_v18, %v174_v17 }
 0x125   :  { %v177_v20 = vrot.slane %v176_v19, 1 }
 0x127   :  { %v178_v21 = vadd.f32 %v177_v20, %v176_v19 }
 0x129   :  { %v180_v22 = vmul.f32 0.125, %v178_v21 }
 0x12b   :  { %v181_v23 = vsub.f32 %v172_v12, %v180_v22 }
 0x12d   :  { %v182_v24 = vmul.f32 %v181_v23, %v181_v23 }
 0x12f   :  { %v183_v25 = vrot.slane %v182_v24, 4 }
 0x131   :  { %v184_v26 = vadd.f32 %v183_v25, %v182_v24 }
 0x133   :  { %v185_v27 = vrot.slane %v184_v26, 2 }
 0x135   :  { %v186_v28 = vadd.f32 %v185_v27, %v184_v26 }
 0x137   :  { %v187_v29 = vrot.slane %v186_v28, 1 }
 0x139   :  { %v188_v30 = vadd.f32 %v187_v29, %v186_v28 }
 0x13b   :  { %v189_v31 = vmul.f32 0.125, %v188_v30 }
 0x13d   :  { %v190_v32 = vadd.f32 1e-05, %v189_v31 }
 0x13f   :  { %283 = vrsqrt.f32 %v190_v32 }
 0x149   :  { %v284_v33 = vpop.eup %283 }
 0x14a   :  { %v192_v35 = vmul.f32 %v284_v33, %v181_v23 }
 0x14c   :  { %v200_v37 = vmul.f32 %v237_v34, %v192_v35 }
 0x14e   :  { %v208_v38 = vadd.f32 %v238_v36, %v200_v37 }
 0x150   :  { %v209_v39 = vmax.f32 %v208_v38, 0.0 }
 0x152   :  { %v210_v40 = vpack.c.bf16 %v209_v39, %v209_v39 }
 0x154   :  { %211 = vst [vmem:[#allocation8] sm:$0xf] %v210_v40 }
 0x155   :  { %340 = shalt.err (!%p337_p6)
}
 0x156   :  { %s341_s26 = scalar_lea.hbm %s451_s5, 64 }
 0x157   :  { %p342_p7 = scmp.ne.s32.totalorder %s451_s5, %s341_s26  ;;  %p345_p8 = scmp.lt.u32.totalorder %s341_s26, %s451_s5 }
 0x159   :  { %p347_p9 = pnand %p345_p8, %p342_p7 }
 0x15b   :  { %350 = shalt.err (!%p347_p9)
}
 0x15c   :  { %221 = dma.vmem_to_hbm [thread:$0]  %s219_s23, 64, %s451_s5, [#allocation5]  }
 0x15d   :  { %355 = dma.done.wait [#allocation5], 64  }
 0x15e   :  { %356 = vsyncadd [#allocation5], 4294967232 }
 0x15f   :  { %225 = vsyncpa [#allocation4], 1 }
 0x160   :  { %226 = vsyncpa [#allocation7], 1 }
 0x161   :  { %227 = vsyncpa [#allocation5], 1 }

</bundles_post_ra>
